<compile_context>
chip_gen: v7x
topology: tpu7x:2x2x1
jax: 0.10.0
libtpu: 0.0.40
codegen_flags: <defaults>
</compile_context>

<pallas_src>
import math
from functools import lru_cache

import jax
import jax.numpy as jnp
from jax import lax
from jax.experimental import pallas as pl
from jax.experimental.pallas import tpu as pltpu


LANE = 128      # pad feature dims (emb_size, op_size) to this many lanes
SUBLANE = 8     # minimum row padding


def _round_up(x, m):
    return ((x + m - 1) // m) * m


def _bucket(n):
    """Bucket a row count to a small fixed set of shapes (avoid recompiles)."""
    return max(SUBLANE, int(pl.next_power_of_2(max(int(n), 1))))


# -----------------------------------------------------------------------------
# Fused whole-tree kernel.
#   For each internal node i (post-order):
#     h_i  = tanh(L @ Wl + R @ Wr + b)      (== tanh([L|R] @ W + b))
#     op_i = h_i @ Gw + gb
#   with L/R gathered from a VMEM-resident node-embedding table and h_i
#   scattered back into it (children are always computed before parents).
# -----------------------------------------------------------------------------
def _tree_kernel(left_ref, right_ref, meta_ref,                 # SMEM (prefetch)
                 tab0_ref, wl_ref, wr_ref, b_ref, gw_ref, gb_ref,   # VMEM in
                 emb_out_ref, op_out_ref,                       # VMEM out
                 tab):                                          # VMEM scratch (f32)
    # bf16 table from HBM -> f32 working table in VMEM (read/write).
    tab[...] = tab0_ref[...].astype(jnp.float32)
    op_out_ref[...] = jnp.zeros_like(op_out_ref)   # pad rows stay defined

    n_internal = meta_ref[0]
    n_leaves = meta_ref[1]

    def body(i, carry):
        li = left_ref[i]
        ri = right_ref[i]
        lvec = tab[pl.ds(li, 1), :].astype(jnp.bfloat16)     # [1, Ep]
        rvec = tab[pl.ds(ri, 1), :].astype(jnp.bfloat16)     # [1, Ep]
        pre = (jnp.dot(lvec, wl_ref[...], preferred_element_type=jnp.float32)
               + jnp.dot(rvec, wr_ref[...], preferred_element_type=jnp.float32)
               + b_ref[...])
        h = jnp.tanh(pre)                                    # f32 [1, Ep]
        tab[pl.ds(n_leaves + i, 1), :] = h                   # scatter back
        op = jnp.dot(h.astype(jnp.bfloat16), gw_ref[...],
                     preferred_element_type=jnp.float32) + gb_ref[...]
        op_out_ref[pl.ds(i, 1), :] = op
        return carry

    lax.fori_loop(0, n_internal, body, None)
    emb_out_ref[...] = tab[...].astype(emb_out_ref.dtype)


@lru_cache(maxsize=None)
def _get_tree_fn(T, M, Ep, OPp):
    """Memoized pallas_call per (node-table rows, schedule rows) bucket."""
    grid_spec = pltpu.PrefetchScalarGridSpec(
        num_scalar_prefetch=3,                  # left_idx, right_idx, meta
        grid=(1,),
        in_specs=[
            pl.BlockSpec((T, Ep), lambda i, *_: (0, 0)),     # node table (bf16)
            pl.BlockSpec((Ep, Ep), lambda i, *_: (0, 0)),    # Wl (bf16)
            pl.BlockSpec((Ep, Ep), lambda i, *_: (0, 0)),    # Wr (bf16)
            pl.BlockSpec((1, Ep), lambda i, *_: (0, 0)),     # b  (f32)
            pl.BlockSpec((Ep, OPp), lambda i, *_: (0, 0)),   # Gw (bf16)
            pl.BlockSpec((1, OPp), lambda i, *_: (0, 0)),    # gb (f32)
        ],
        out_specs=(
            pl.BlockSpec((T, Ep), lambda i, *_: (0, 0)),     # final table (bf16)
            pl.BlockSpec((M, OPp), lambda i, *_: (0, 0)),    # op logits (f32)
        ),
        scratch_shapes=[pltpu.VMEM((T, Ep), jnp.float32)],
    )
    fn = pl.pallas_call(
        _tree_kernel,
        out_shape=(jax.ShapeDtypeStruct((T, Ep), jnp.bfloat16),
                   jax.ShapeDtypeStruct((M, OPp), jnp.float32)),
        grid_spec=grid_spec,
        compiler_params=pltpu.CompilerParams(
            dimension_semantics=("arbitrary",)),
    )
    return jax.jit(fn)


# -----------------------------------------------------------------------------
# Parameter init (PyTorch-Linear-style uniform(-1/sqrt(fan_in), 1/sqrt(fan_in))),
# pre-transposed to [in, out], split into left/right halves of the concat, and
# zero-padded into lane-dense layouts (zero padding keeps padded lanes at 0
# through tanh because the padded bias lanes are also 0).
# -----------------------------------------------------------------------------
def init_recursive_params(key, emb_size, op_size):
    Ep = _round_up(emb_size, LANE)
    OPp = _round_up(op_size, LANE)
    kw, kb, kgw, kgb = jax.random.split(key, 4)

    bw = 1.0 / math.sqrt(2 * emb_size)
    w = jax.random.uniform(kw, (2 * emb_size, emb_size), jnp.float32, -bw, bw)
    b = jax.random.uniform(kb, (emb_size,), jnp.float32, -bw, bw)

    bg = 1.0 / math.sqrt(emb_size)
    gw = jax.random.uniform(kgw, (emb_size, op_size), jnp.float32, -bg, bg)
    gb = jax.random.uniform(kgb, (op_size,), jnp.float32, -bg, bg)

    wl = jnp.zeros((Ep, Ep), jnp.float32).at[:emb_size, :emb_size].set(w[:emb_size])
    wr = jnp.zeros((Ep, Ep), jnp.float32).at[:emb_size, :emb_size].set(w[emb_size:])
    bp = jnp.zeros((1, Ep), jnp.float32).at[0, :emb_size].set(b)

    gwp = jnp.zeros((Ep, OPp), jnp.float32).at[:emb_size, :op_size].set(gw)
    gbp = jnp.zeros((1, OPp), jnp.float32).at[0, :op_size].set(gb)

    return {
        "wl": wl.astype(jnp.bfloat16),   # bf16 weights, f32 accumulate in-kernel
        "wr": wr.astype(jnp.bfloat16),
        "b": bp,
        "gw": gwp.astype(jnp.bfloat16),
        "gb": gbp,
        "Ep": Ep,
        "OPp": OPp,
    }


# -----------------------------------------------------------------------------
# Host-side tree bookkeeping (mirrors the PyTorch module's semantics)
# -----------------------------------------------------------------------------
class TreeNode:
    def __init__(self, node_value, left_node=None, right_node=None):
        self.node_value = node_value
        self.left_node = left_node
        self.right_node = right_node
        self.is_leaf = left_node is None and right_node is None
        self.embedding = None


def _build_schedule(root):
    """Post-order schedule: leaves get rows [0, nl); internal nodes get rows
    nl + i in post-order, so every child row exists before its parent runs."""
    leaves, internal = [], []

    def post(n):
        if n.is_leaf:
            leaves.append(n)
            return
        post(n.left_node)
        post(n.right_node)
        internal.append(n)

    post(root)
    row = {id(n): i for i, n in enumerate(leaves)}
    nl = len(leaves)
    for i, n in enumerate(internal):
        row[id(n)] = nl + i
    left = [row[id(n.left_node)] for n in internal]
    right = [row[id(n.right_node)] for n in internal]
    return leaves, internal, left, right


class RecursiveNN:
    def __init__(self, emb_size, op_size, op_list, key):
        self.emb_size = emb_size
        self.op_size = op_size
        self.classes = op_list
        self.params = init_recursive_params(key, emb_size, op_size)
        self.Ep = self.params["Ep"]
        self.OPp = self.params["OPp"]

    def forward(self, expression_tree, num_embedding, look_up, out_idx2symbol):
        self.out_idx2symbol = out_idx2symbol
        E, Ep, OPp = self.emb_size, self.Ep, self.OPp

        leaves, internal, left, right = _build_schedule(expression_tree)
        nl, ni = len(leaves), len(internal)

        # Leaf embeddings: one vectorized gather (symbol not in look_up -> row 0).
        sym_idx = [look_up.index(n.node_value) if n.node_value in look_up else 0
                   for n in leaves]
        num_embedding = jnp.asarray(num_embedding, jnp.float32)
        leaf_emb = num_embedding[jnp.asarray(sym_idx, jnp.int32)]       # [nl, E]
        for n, e in zip(leaves, leaf_emb):          # module side-effect only
            n.embedding = e

        self.labelList = [self.classes.index(n.node_value) for n in internal]
        if ni == 0:
            self.nodeProbList = jnp.zeros((0, self.op_size), jnp.float32)
            return self.nodeProbList, jnp.zeros((0,), jnp.int32)

        # Fixed-bucket padded shapes -> compile-cache hits across trees.
        T = _bucket(nl + ni)
        M = _bucket(ni)

        table0 = jnp.zeros((T, Ep), jnp.bfloat16)
        table0 = table0.at[:nl, :E].set(leaf_emb.astype(jnp.bfloat16))
        left_a = jnp.zeros((M,), jnp.int32).at[:ni].set(jnp.asarray(left, jnp.int32))
        right_a = jnp.zeros((M,), jnp.int32).at[:ni].set(jnp.asarray(right, jnp.int32))
        meta = jnp.asarray([ni, nl], jnp.int32)

        p = self.params
        emb_tab, op_all = _get_tree_fn(T, M, Ep, OPp)(
            left_a, right_a, meta,
            table0, p["wl"], p["wr"], p["b"], p["gw"], p["gb"])

        # Side-effect bookkeeping: internal node embeddings (one slice, then views).
        internal_emb = emb_tab[nl:nl + ni, :E].astype(jnp.float32)
        for i, n in enumerate(internal):
            n.embedding = internal_emb[i]

        nodeProb = op_all[:ni, :self.op_size]       # single slice for all nodes
        self.nodeProbList = nodeProb                # stacked (post-order) rows
        label = jnp.asarray(self.labelList, jnp.int32)
        return nodeProb, label


# -----------------------------------------------------------------------------
# Pure-JAX reference (mirrors the kernel's bf16 casts) for a tolerance check.
# -----------------------------------------------------------------------------
def _reference_forward(model, tree, num_embedding, look_up):
    E, Ep = model.emb_size, model.Ep
    p = model.params
    probs = []

    def emb_of(node):
        if node.is_leaf:
            s = node.node_value
            i = look_up.index(s) if s in look_up else 0
            v = jnp.zeros((1, Ep), jnp.float32).at[0, :E].set(num_embedding[i])
            return v.astype(jnp.bfloat16).astype(jnp.float32)
        l = emb_of(node.left_node)
        r = emb_of(node.right_node)
        pre = (jnp.dot(l.astype(jnp.bfloat16), p["wl"],
                       preferred_element_type=jnp.float32)
               + jnp.dot(r.astype(jnp.bfloat16), p["wr"],
                         preferred_element_type=jnp.float32)
               + p["b"])
        h = jnp.tanh(pre)
        op = jnp.dot(h.astype(jnp.bfloat16), p["gw"],
                     preferred_element_type=jnp.float32) + p["gb"]
        probs.append(op[:, :model.op_size])
        return h

    emb_of(tree)
    return jnp.concatenate(probs, axis=0)


# -----------------------------------------------------------------------------
# Demo
# -----------------------------------------------------------------------------
if __name__ == "__main__":
    E = 32
    op_list = ["+", "-", "*", "/"]
    OP = len(op_list)

    key = jax.random.PRNGKey(0)
    k_model, k_emb = jax.random.split(key)
    model = RecursiveNN(E, OP, op_list, k_model)

    look_up = ["n0", "n1", "n2"]
    num_embedding = jax.random.normal(k_emb, (len(look_up), E), jnp.float32)

    # expression tree: (n0 + n1) * (n2 - 1)   ("1" not in look_up -> num_embedding[0])
    tree = TreeNode(
        "*",
        TreeNode("+", TreeNode("n0"), TreeNode("n1")),
        TreeNode("-", TreeNode("n2"), TreeNode("1")),
    )

    node_prob, label = model.forward(tree, num_embedding, look_up, op_list)
    node_prob = jax.block_until_ready(node_prob)
    label = jax.block_until_ready(label)

    # 3 internal nodes, post-order "+", "-", "*"
    assert node_prob.shape == (3, OP), node_prob.shape
    assert label.shape == (3,), label.shape
    assert [int(x) for x in label] == [op_list.index("+"),
                                       op_list.index("-"),
                                       op_list.index("*")]
    assert bool(jnp.all(jnp.isfinite(node_prob)))

    # Numerical check against a pure-JAX reference using identical bf16 casts.
    ref = jax.block_until_ready(
        _reference_forward(model, tree, num_embedding, look_up))
    assert bool(jnp.allclose(node_prob, ref, atol=1e-2, rtol=1e-2)), (
        node_prob, ref)

    print("KERNEL_OK")
</pallas_src>

<mosaic_0001>
module attributes {stable_mosaic.version = 11 : i64} {
  func.func @_tree_kernel(%arg0: i32, %arg1: memref<8xi32, #tpu.memory_space<smem>>, %arg2: memref<8xi32, #tpu.memory_space<smem>>, %arg3: memref<2xi32, #tpu.memory_space<smem>>, %arg4: memref<8x128xbf16, #tpu.memory_space<vmem>>, %arg5: memref<128x128xbf16, #tpu.memory_space<vmem>>, %arg6: memref<128x128xbf16, #tpu.memory_space<vmem>>, %arg7: memref<1x128xf32, #tpu.memory_space<vmem>>, %arg8: memref<128x128xbf16, #tpu.memory_space<vmem>>, %arg9: memref<1x128xf32, #tpu.memory_space<vmem>>, %arg10: memref<8x128xbf16, #tpu.memory_space<vmem>>, %arg11: memref<8x128xf32, #tpu.memory_space<vmem>>, %arg12: memref<8x128xf32, #tpu.memory_space<vmem>>) attributes {dimension_semantics = [#tpu.dimension_semantics<arbitrary>], iteration_bounds = array<i64: 1>, scalar_prefetch = 3 : i64, scratch_operands = 1 : i64, tpu.core_type = #tpu.core_type<tc>, window_params = [{pipeline_mode = #tpu.pipeline_mode<synchronous>, transform_indices = @transform_0, window_bounds = array<i64: 8, 128>}, {pipeline_mode = #tpu.pipeline_mode<synchronous>, transform_indices = @transform_1, window_bounds = array<i64: 128, 128>}, {pipeline_mode = #tpu.pipeline_mode<synchronous>, transform_indices = @transform_2, window_bounds = array<i64: 128, 128>}, {pipeline_mode = #tpu.pipeline_mode<synchronous>, transform_indices = @transform_3, window_bounds = array<i64: 1, 128>}, {pipeline_mode = #tpu.pipeline_mode<synchronous>, transform_indices = @transform_4, window_bounds = array<i64: 128, 128>}, {pipeline_mode = #tpu.pipeline_mode<synchronous>, transform_indices = @transform_5, window_bounds = array<i64: 1, 128>}, {pipeline_mode = #tpu.pipeline_mode<synchronous>, transform_indices = @transform_6, window_bounds = array<i64: 8, 128>}, {pipeline_mode = #tpu.pipeline_mode<synchronous>, transform_indices = @transform_7, window_bounds = array<i64: 8, 128>}]} {
    %c0 = arith.constant 0 : index
    %c0_0 = arith.constant 0 : index
    %0 = vector.load %arg4[%c0, %c0_0] : memref<8x128xbf16, #tpu.memory_space<vmem>>, vector<8x128xbf16>
    %1 = arith.extf %0 : vector<8x128xbf16> to vector<8x128xf32>
    %c0_1 = arith.constant 0 : index
    %c0_2 = arith.constant 0 : index
    %2 = vector.load %arg12[%c0_1, %c0_2] : memref<8x128xf32, #tpu.memory_space<vmem>>, vector<8x128xf32>
    tpu.vector_store %arg12[%c0_1, %c0_2], %1 {strides = array<i32>} : memref<8x128xf32, #tpu.memory_space<vmem>>, vector<8x128xf32>,
    %cst = arith.constant 0.000000e+00 : f32
    %3 = vector.broadcast %cst : f32 to vector<8x128xf32>
    %c0_3 = arith.constant 0 : index
    %c0_4 = arith.constant 0 : index
    %4 = vector.load %arg11[%c0_3, %c0_4] : memref<8x128xf32, #tpu.memory_space<vmem>>, vector<8x128xf32>
    tpu.vector_store %arg11[%c0_3, %c0_4], %3 {strides = array<i32>} : memref<8x128xf32, #tpu.memory_space<vmem>>, vector<8x128xf32>,
    %c0_5 = arith.constant 0 : index
    %5 = memref.load %arg3[%c0_5] : memref<2xi32, #tpu.memory_space<smem>>
    %c1 = arith.constant 1 : index
    %6 = memref.load %arg3[%c1] : memref<2xi32, #tpu.memory_space<smem>>
    %c0_i32 = arith.constant 0 : i32
    %7 = arith.subi %5, %c0_i32 : i32
    %8 = arith.addi %c0_i32, %7 : i32
    %c1_i32 = arith.constant 1 : i32
    scf.for %arg13 = %c0_i32 to %8 step %c1_i32  : i32 {
      %12 = arith.index_cast %arg13 : i32 to index
      %13 = memref.load %arg1[%12] : memref<8xi32, #tpu.memory_space<smem>>
      %14 = arith.index_cast %arg13 : i32 to index
      %15 = memref.load %arg2[%14] : memref<8xi32, #tpu.memory_space<smem>>
      %16 = arith.index_cast %13 : i32 to index
      %c0_10 = arith.constant 0 : index
      %17 = vector.load %arg12[%16, %c0_10] : memref<8x128xf32, #tpu.memory_space<vmem>>, vector<1x128xf32>
      %18 = arith.truncf %17 : vector<1x128xf32> to vector<1x128xbf16>
      %19 = arith.index_cast %15 : i32 to index
      %c0_11 = arith.constant 0 : index
      %20 = vector.load %arg12[%19, %c0_11] : memref<8x128xf32, #tpu.memory_space<vmem>>, vector<1x128xf32>
      %21 = arith.truncf %20 : vector<1x128xf32> to vector<1x128xbf16>
      %c0_12 = arith.constant 0 : index
      %c0_13 = arith.constant 0 : index
      %22 = vector.load %arg5[%c0_12, %c0_13] : memref<128x128xbf16, #tpu.memory_space<vmem>>, vector<128x128xbf16>
      %cst_14 = arith.constant dense<0.000000e+00> : vector<1x128xf32>
      %23 = tpu.matmul %18, %22, %cst_14 {dimension_numbers = #tpu.dot_dimension_numbers<[1], [0], [0], [1], [0, 0, 1, 1], [], []>} : vector<1x128xbf16>, vector<128x128xbf16>, vector<1x128xf32> -> vector<1x128xf32>
      %c0_15 = arith.constant 0 : index
      %c0_16 = arith.constant 0 : index
      %24 = vector.load %arg6[%c0_15, %c0_16] : memref<128x128xbf16, #tpu.memory_space<vmem>>, vector<128x128xbf16>
      %cst_17 = arith.constant dense<0.000000e+00> : vector<1x128xf32>
      %25 = tpu.matmul %21, %24, %cst_17 {dimension_numbers = #tpu.dot_dimension_numbers<[1], [0], [0], [1], [0, 0, 1, 1], [], []>} : vector<1x128xbf16>, vector<128x128xbf16>, vector<1x128xf32> -> vector<1x128xf32>
      %26 = arith.addf %23, %25 : vector<1x128xf32>
      %c0_18 = arith.constant 0 : index
      %c0_19 = arith.constant 0 : index
      %27 = vector.load %arg7[%c0_18, %c0_19] : memref<1x128xf32, #tpu.memory_space<vmem>>, vector<1x128xf32>
      %28 = arith.addf %26, %27 : vector<1x128xf32>
      %29 = math.tanh %28 : vector<1x128xf32>
      %30 = arith.addi %6, %arg13 : i32
      %31 = arith.index_cast %30 : i32 to index
      %c0_20 = arith.constant 0 : index
      %32 = vector.load %arg12[%31, %c0_20] : memref<8x128xf32, #tpu.memory_space<vmem>>, vector<1x128xf32>
      tpu.vector_store %arg12[%31, %c0_20], %29 {strides = array<i32>} : memref<8x128xf32, #tpu.memory_space<vmem>>, vector<1x128xf32>,
      %33 = arith.truncf %29 : vector<1x128xf32> to vector<1x128xbf16>
      %c0_21 = arith.constant 0 : index
      %c0_22 = arith.constant 0 : index
      %34 = vector.load %arg8[%c0_21, %c0_22] : memref<128x128xbf16, #tpu.memory_space<vmem>>, vector<128x128xbf16>
      %cst_23 = arith.constant dense<0.000000e+00> : vector<1x128xf32>
      %35 = tpu.matmul %33, %34, %cst_23 {dimension_numbers = #tpu.dot_dimension_numbers<[1], [0], [0], [1], [0, 0, 1, 1], [], []>} : vector<1x128xbf16>, vector<128x128xbf16>, vector<1x128xf32> -> vector<1x128xf32>
      %c0_24 = arith.constant 0 : index
      %c0_25 = arith.constant 0 : index
      %36 = vector.load %arg9[%c0_24, %c0_25] : memref<1x128xf32, #tpu.memory_space<vmem>>, vector<1x128xf32>
      %37 = arith.addf %35, %36 : vector<1x128xf32>
      %38 = arith.index_cast %arg13 : i32 to index
      %c0_26 = arith.constant 0 : index
      %39 = vector.load %arg11[%38, %c0_26] : memref<8x128xf32, #tpu.memory_space<vmem>>, vector<1x128xf32>
      tpu.vector_store %arg11[%38, %c0_26], %37 {strides = array<i32>} : memref<8x128xf32, #tpu.memory_space<vmem>>, vector<1x128xf32>,
    }
    %c0_6 = arith.constant 0 : index
    %c0_7 = arith.constant 0 : index
    %9 = vector.load %arg12[%c0_6, %c0_7] : memref<8x128xf32, #tpu.memory_space<vmem>>, vector<8x128xf32>
    %10 = arith.truncf %9 : vector<8x128xf32> to vector<8x128xbf16>
    %c0_8 = arith.constant 0 : index
    %c0_9 = arith.constant 0 : index
    %11 = vector.load %arg10[%c0_8, %c0_9] : memref<8x128xbf16, #tpu.memory_space<vmem>>, vector<8x128xbf16>
    tpu.vector_store %arg10[%c0_8, %c0_9], %10 {strides = array<i32>} : memref<8x128xbf16, #tpu.memory_space<vmem>>, vector<8x128xbf16>,
    return
  }
  func.func @transform_0(%arg0: i32, %arg1: memref<8xi32, #tpu.memory_space<smem>>, %arg2: memref<8xi32, #tpu.memory_space<smem>>, %arg3: memref<2xi32, #tpu.memory_space<smem>>) -> (i32, i32) {
    %c0_i32 = arith.constant 0 : i32
    %c0_i32_0 = arith.constant 0 : i32
    %c0_i32_1 = arith.constant 0 : i32
    return %c0_i32, %c0_i32_0 : i32, i32
  }
  func.func @transform_1(%arg0: i32, %arg1: memref<8xi32, #tpu.memory_space<smem>>, %arg2: memref<8xi32, #tpu.memory_space<smem>>, %arg3: memref<2xi32, #tpu.memory_space<smem>>) -> (i32, i32) {
    %c0_i32 = arith.constant 0 : i32
    %c0_i32_0 = arith.constant 0 : i32
    %c0_i32_1 = arith.constant 0 : i32
    return %c0_i32, %c0_i32_0 : i32, i32
  }
  func.func @transform_2(%arg0: i32, %arg1: memref<8xi32, #tpu.memory_space<smem>>, %arg2: memref<8xi32, #tpu.memory_space<smem>>, %arg3: memref<2xi32, #tpu.memory_space<smem>>) -> (i32, i32) {
    %c0_i32 = arith.constant 0 : i32
    %c0_i32_0 = arith.constant 0 : i32
    %c0_i32_1 = arith.constant 0 : i32
    return %c0_i32, %c0_i32_0 : i32, i32
  }
  func.func @transform_3(%arg0: i32, %arg1: memref<8xi32, #tpu.memory_space<smem>>, %arg2: memref<8xi32, #tpu.memory_space<smem>>, %arg3: memref<2xi32, #tpu.memory_space<smem>>) -> (i32, i32) {
    %c0_i32 = arith.constant 0 : i32
    %c0_i32_0 = arith.constant 0 : i32
    %c0_i32_1 = arith.constant 0 : i32
    return %c0_i32, %c0_i32_0 : i32, i32
  }
  func.func @transform_4(%arg0: i32, %arg1: memref<8xi32, #tpu.memory_space<smem>>, %arg2: memref<8xi32, #tpu.memory_space<smem>>, %arg3: memref<2xi32, #tpu.memory_space<smem>>) -> (i32, i32) {
    %c0_i32 = arith.constant 0 : i32
    %c0_i32_0 = arith.constant 0 : i32
    %c0_i32_1 = arith.constant 0 : i32
    return %c0_i32, %c0_i32_0 : i32, i32
  }
  func.func @transform_5(%arg0: i32, %arg1: memref<8xi32, #tpu.memory_space<smem>>, %arg2: memref<8xi32, #tpu.memory_space<smem>>, %arg3: memref<2xi32, #tpu.memory_space<smem>>) -> (i32, i32) {
    %c0_i32 = arith.constant 0 : i32
    %c0_i32_0 = arith.constant 0 : i32
    %c0_i32_1 = arith.constant 0 : i32
    return %c0_i32, %c0_i32_0 : i32, i32
  }
  func.func @transform_6(%arg0: i32, %arg1: memref<8xi32, #tpu.memory_space<smem>>, %arg2: memref<8xi32, #tpu.memory_space<smem>>, %arg3: memref<2xi32, #tpu.memory_space<smem>>) -> (i32, i32) {
    %c0_i32 = arith.constant 0 : i32
    %c0_i32_0 = arith.constant 0 : i32
    %c0_i32_1 = arith.constant 0 : i32
    return %c0_i32, %c0_i32_0 : i32, i32
  }
  func.func @transform_7(%arg0: i32, %arg1: memref<8xi32, #tpu.memory_space<smem>>, %arg2: memref<8xi32, #tpu.memory_space<smem>>, %arg3: memref<2xi32, #tpu.memory_space<smem>>) -> (i32, i32) {
    %c0_i32 = arith.constant 0 : i32
    %c0_i32_0 = arith.constant 0 : i32
    %c0_i32_1 = arith.constant 0 : i32
    return %c0_i32, %c0_i32_0 : i32, i32
  }
}

</mosaic_0001>

<bundles_post_ra>
// kernel: tpu_custom_call.1
= control target key start
LH: loop header
LB: loop body
LE: loop exit
PB: predicated region body
PF: predicated region fallthrough
CT: control target
= control target key end

     0   :  { %s1011_s0 = inlined_call_operand.hbm [shape: s32[8], index: 0, kind: input, shape index: {}]   ;;  %s1012_s3 = inlined_call_operand.vmem [shape: bf16[8,128], index: 3, kind: input, shape index: {}]   ;;  %s1013_s4 = inlined_call_operand.hbm [shape: bf16[128,128], index: 4, kind: input, shape index: {}]   ;;  %s1014_s5 = inlined_call_operand.hbm [shape: bf16[128,128], index: 5, kind: input, shape index: {}]   ;;  %s1015_s6 = inlined_call_operand.vmem [shape: f32[1,128], index: 6, kind: input, shape index: {}]   ;;  %s1016_s7 = inlined_call_operand.hbm [shape: bf16[128,128], index: 7, kind: input, shape index: {}]   ;;  %s1017_s8 = inlined_call_operand.vmem [shape: f32[1,128], index: 8, kind: input, shape index: {}]   ;;  %s1018_s9 = inlined_call_operand.hbm [shape: bf16[8,128], index: 9, kind: output, shape index: {0}]   ;;  %s1019_s10 = inlined_call_operand.hbm [shape: f32[8,128], index: 10, kind: output, shape index: {1}]   ;;  %s1020_s1 = inlined_call_operand.vmem [shape: s32[8], index: 1, kind: input, shape index: {}]   ;;  %s1021_s2 = inlined_call_operand.vmem [shape: s32[2], index: 2, kind: input, shape index: {}]  }
   0x1   :  { %s629_s15 = scalar_lea.hbm %s1011_s0, 16 }
   0x2   :  { %p630_p0 = scmp.ne.s32.totalorder %s1011_s0, %s629_s15  ;;  %p633_p1 = scmp.lt.u32.totalorder %s629_s15, %s1011_s0 }
   0x4   :  { %p635_p2 = pnand %p633_p1, %p630_p0 }
   0x6   :  { %638 = shalt.err (!%p635_p2)  }
   0x7   :  { %s791_s20 = smov [#allocation4]   ;;  %s18_s25 = sshll.u32 %s1020_s1, 4  ;;  %s19_s25 = int_to_ptr.vmem [resolvable:$true] %s18_s25 }
   0x8   :  { %17 = dma.hbm_to_smem %s1011_s0, 16, %s791_s20, [#allocation3] }
   0x9   :  { %s22_s28 = sshll.u32 %s1021_s2, 4  ;;  %s639_s29 = scalar_lea.vmem %s19_s25, 16  ;;  %s23_s28 = int_to_ptr.vmem [resolvable:$true] %s22_s28 }
   0xa   :  { %p640_p3 = scmp.ne.s32.totalorder %s19_s25, %s639_s29  ;;  %p644_p4 = scmp.lt.s32.totalorder %s19_s25, %s19_s25 }
   0xb   :  { %p645_p5 = scmp.lt.s32.totalorder %s639_s29, %s639_s29 }
   0xd   :  { %p646_p6 = por %p645_p5, %p644_p4 }
   0xf   :  { %p647_p7 = pnand %p646_p6, %p640_p3 }
  0x11   :  { %650 = shalt.err (!%p647_p7)  }
  0x12   :  { %s792_s30 = smov [#allocation5]   ;;  %s651_s0 = scalar_lea.vmem %s23_s28, 16 }
  0x13   :  { %21 = dma.vmem_to_smem %s19_s25, 16, %s792_s30, [#allocation3] }
  0x14   :  { %p652_p8 = scmp.ne.s32.totalorder %s23_s28, %s651_s0  ;;  %p656_p9 = scmp.lt.s32.totalorder %s23_s28, %s23_s28 }
  0x15   :  { %p657_p10 = scmp.lt.s32.totalorder %s651_s0, %s651_s0 }
  0x17   :  { %p658_p11 = por %p657_p10, %p656_p9 }
  0x19   :  { %p659_p12 = pnand %p658_p11, %p652_p8 }
  0x1b   :  { %662 = shalt.err (!%p659_p12)  }
  0x1c   :  { %s793_s1 = smov [#allocation6]  }
  0x1d   :  { %25 = dma.vmem_to_smem %s23_s28, 16, %s793_s1, [#allocation3] }
  0x1e   :  { %777 = dma.done.wait [#allocation3], 48 }
  0x1f   :  { %778 = vsyncadd [#allocation3], 4294967248 }
  0x20   :  { %27 = sfence }
  0x21   :  { %28 = vsyncpa [#allocation8], 0 }
  0x22   :  { %29 = vsyncpa [#allocation11], 0 }
  0x23   :  { %30 = vsyncpa [#allocation9], 0 }
  0x24   :  { %31 = vsyncpa [#allocation15], 0  ;;  %s794_s2 = smov [#allocation10]   ;;  %s795_s12 = smov [#allocation7]  }
  0x25   :  { %s51_s11 = sshll.u32 %s794_s2, 4  ;;  %s39_s13 = sshll.u32 %s795_s12, 4  ;;  %s52_s11 = int_to_ptr.vmem [resolvable:$true] %s51_s11  ;;  %s877_s13 = int_to_ptr.vmem [resolvable:$true] %s39_s13 }
  0x26   :  { %s663_s16 = scalar_lea.hbm %s1014_s5, 1024 }
  0x27   :  { %p664_p13 = scmp.ne.s32.totalorder %s1014_s5, %s663_s16  ;;  %p667_p0 = scmp.lt.u32.totalorder %s663_s16, %s1014_s5 }
  0x29   :  { %p669_p1 = pnand %p667_p0, %p664_p13 }
  0x2b   :  { %672 = shalt.err (!%p669_p1)
}
  0x2c   :  { %s673_s21 = scalar_lea.vmem %s52_s11, 1024  ;;  %p678_p3 = scmp.lt.s32.totalorder %s52_s11, %s52_s11 }
  0x2d   :  { %p674_p2 = scmp.ne.s32.totalorder %s52_s11, %s673_s21  ;;  %p679_p4 = scmp.lt.s32.totalorder %s673_s21, %s673_s21 }
  0x2f   :  { %p680_p5 = por %p679_p4, %p678_p3 }
  0x31   :  { %p681_p6 = pnand %p680_p5, %p674_p2 }
  0x33   :  { %684 = shalt.err (!%p681_p6)
}
  0x34   :  { %s796_s22 = smov 64   ;;  %s797_s23 = smov 4  }
  0x35   :  { %57 = dma.hbm_to_vmem [thread:$0]  %s1014_s5, 1024, %s52_s11, [#allocation11], %s796_s22, %s796_s22, %s797_s23  }
  0x36   :  { %s685_s28 = scalar_lea.hbm %s1013_s4, 1024 }
  0x37   :  { %p686_p7 = scmp.ne.s32.totalorder %s1013_s4, %s685_s28  ;;  %p689_p8 = scmp.lt.u32.totalorder %s685_s28, %s1013_s4 }
  0x39   :  { %p691_p9 = pnand %p689_p8, %p686_p7 }
  0x3b   :  { %694 = shalt.err (!%p691_p9)
}
  0x3c   :  { %s695_s2 = scalar_lea.vmem %s877_s13, 1024  ;;  %p700_p11 = scmp.lt.s32.totalorder %s877_s13, %s877_s13 }
  0x3d   :  { %p696_p10 = scmp.ne.s32.totalorder %s877_s13, %s695_s2  ;;  %p701_p12 = scmp.lt.s32.totalorder %s695_s2, %s695_s2 }
  0x3f   :  { %p702_p13 = por %p701_p12, %p700_p11 }
  0x41   :  { %p703_p0 = pnand %p702_p13, %p696_p10 }
  0x43   :  { %706 = shalt.err (!%p703_p0)
}
  0x44   :  { %45 = dma.hbm_to_vmem [thread:$0]  %s1013_s4, 1024, %s877_s13, [#allocation8], %s796_s22, %s796_s22, %s797_s23  }
  0x45   :  { %s798_s12 = smov [#allocation12]   ;;  %s707_s17 = scalar_lea.hbm %s1016_s7, 1024 }
  0x46   :  { %s65_s14 = sshll.u32 %s798_s12, 4  ;;  %p708_p1 = scmp.ne.s32.totalorder %s1016_s7, %s707_s17  ;;  %s66_s14 = int_to_ptr.vmem [resolvable:$true] %s65_s14 }
  0x47   :  { %p711_p2 = scmp.lt.u32.totalorder %s707_s17, %s1016_s7 }
  0x49   :  { %p713_p3 = pnand %p711_p2, %p708_p1 }
  0x4b   :  { %716 = shalt.err (!%p713_p3)
}
  0x4c   :  { %s717_s24 = scalar_lea.vmem %s66_s14, 1024  ;;  %p722_p5 = scmp.lt.s32.totalorder %s66_s14, %s66_s14 }
  0x4d   :  { %p718_p4 = scmp.ne.s32.totalorder %s66_s14, %s717_s24  ;;  %p723_p6 = scmp.lt.s32.totalorder %s717_s24, %s717_s24 }
  0x4f   :  { %p724_p7 = por %p723_p6, %p722_p5 }
  0x51   :  { %p725_p8 = pnand %p724_p7, %p718_p4 }
  0x53   :  { %728 = shalt.err (!%p725_p8)
}
  0x54   :  { %71 = dma.hbm_to_vmem [thread:$0]  %s1016_s7, 1024, %s66_s14, [#allocation11], %s796_s22, %s796_s22, %s797_s23  }
  0x55   :  { %779 = dma.done.wait [#allocation8], 1024  }
  0x56   :  { %780 = vsyncadd [#allocation8], 4294966272 }
  0x57   :  { %781 = dma.done.wait [#allocation11], 2048  }
  0x58   :  { %782 = vsyncadd [#allocation11], 4294965248  ;;  %s929_s25 = sld [smem:[#allocation6]]  ;;  %s931_s26 = sld [smem:[#allocation6 + $0x1]]  ;;  %v799_v0 = vmov 0.0  }
  0x59   :  { %87 = vst [vmem:[#allocation14] sm:$0xff] %v799_v0  ;;  %v84_v1 = vld [vmem:[%s1012_s3] sm:$0xf] }
  0x5a   :  { %v85_v2 = vunpack.c.l.bf16 %v84_v1 }
  0x5c   :  { %86 = vst [vmem:[#allocation2] sm:$0xff] %v85_v2 }
  0x5e   :  { %p470_p9 = scmp.le.s32.totalorder %s929_s25, 0 }
  0x5f   :  { %s937_s7 = smov (!%p470_p9), 0  }
  0x60   :  { %466 = sbr.rel (%p470_p9) target bundleno = 581 (0x245), region = 69 }
  0x67 LB: > { %v603_v3 = vld [vmem:[#allocation10] sm:$0xff]   ;;  %v800_v4 = vmov 0.0   ;;  %v605_v6 = vld [vmem:[#allocation10 + $0x8] sm:$0xff]   ;;  %vm801_vm0 = vmmov 0   ;;  %v607_v8 = vld [vmem:[#allocation10 + $0x10] sm:$0xff]   ;;  %s97_s3 = sld [smem:[#allocation5 + %s789_s7]]  ;;  %s315_s1 = sadd.s32 %s789_s7, %s931_s26  ;;  %s789_s7 = sphi %s937_s7, %s93_s7  }
  0x68   : > { %522 = vmatprep.subr.bf16.mxu0 %v800_v4  ;;  %542 = vmatprep.subr.bf16.mxu1 %v800_v4  ;;  %v604_v5 = vld [vmem:[#allocation7] sm:$0xff]   ;;  %v606_v7 = vld [vmem:[#allocation7 + $0x8] sm:$0xff]   ;;  %v608_v9 = vld [vmem:[#allocation7 + $0x10] sm:$0xff]   ;;  %s96_s22 = sld [smem:[#allocation4 + %s789_s7]]  ;;  %s316_s2 = scalar_lea.vmem [#allocation2], %s315_s1 }
  0x69   : > { %523 = vmatpush3.bf16.msra.mxu0 %v603_v3  ;;  %538 = vmatprep.mubr.msk.bf16.mxu0 %vm801_vm0, %v800_v4  ;;  %v609_v10 = vld [vmem:[#allocation10 + $0x18] sm:$0xff]   ;;  %v611_v12 = vld [vmem:[#allocation10 + $0x20] sm:$0xff]   ;;  %v613_v14 = vld [vmem:[#allocation10 + $0x28] sm:$0xff]   ;;  %s424_s12 = scalar_lea.vmem [#allocation14], %s789_s7  ;;  %s93_s7 = sadd.s32 1, %s789_s7  }
  0x6a   : > { %543 = vmatpush3.bf16.msra.mxu1 %v604_v5  ;;  %524 = vmatprep.subr.bf16.mxu0 %v800_v4  ;;  %v610_v11 = vld [vmem:[#allocation7 + $0x18] sm:$0xff]   ;;  %v612_v13 = vld [vmem:[#allocation7 + $0x20] sm:$0xff]   ;;  %v614_v15 = vld [vmem:[#allocation7 + $0x28] sm:$0xff]   ;;  %p92_p10 = scmp.ge.s32.totalorder %s93_s7, %s929_s25 }
  0x6b   : > { %544 = vmatprep.subr.bf16.mxu1 %v800_v4  ;;  %558 = vmatprep.mubr.msk.bf16.mxu1 %vm801_vm0, %v800_v4  ;;  %v615_v16 = vld [vmem:[#allocation10 + $0x30] sm:$0xff]   ;;  %v617_v18 = vld [vmem:[#allocation10 + $0x38] sm:$0xff]   ;;  %v619_v24 = vld [vmem:[#allocation12] sm:$0xff]  }
  0x6c   : > { %v616_v17 = vld [vmem:[#allocation7 + $0x30] sm:$0xff]   ;;  %v618_v20 = vld [vmem:[#allocation7 + $0x38] sm:$0xff]   ;;  %v620_v25 = vld [vmem:[#allocation12 + $0x8] sm:$0xff]  }
  0x6d   : > { %525 = vmatpush3.bf16.msra.mxu0 %v605_v6  ;;  %s101_s23 = scalar_lea.vmem [#allocation2], %s97_s3  ;;  %v621_v26 = vld [vmem:[#allocation12 + $0x10] sm:$0xff]   ;;  %v622_v27 = vld [vmem:[#allocation12 + $0x18] sm:$0xff]   ;;  %v623_v28 = vld [vmem:[#allocation12 + $0x20] sm:$0xff]  }
  0x6e   : > { %545 = vmatpush3.bf16.msra.mxu1 %v606_v7  ;;  %526 = vmatprep.subr.bf16.mxu0 %v800_v4  ;;  %v102_v19 = vld [vmem:[%s101_s23] sm:$0x1]  ;;  %s98_s29 = scalar_lea.vmem [#allocation2], %s96_s22  ;;  %v624_v29 = vld [vmem:[#allocation12 + $0x28] sm:$0xff]   ;;  %v626_v31 = vld [vmem:[#allocation12 + $0x38] sm:$0xff]  }
  0x6f   : > { %546 = vmatprep.subr.bf16.mxu1 %v800_v4  ;;  %v99_v21 = vld [vmem:[%s98_s29] sm:$0x1]  ;;  %v103_v22 = vpack.c.bf16 %v102_v19, %v102_v19 }
  0x70   : > { %v100_v23 = vpack.c.bf16 %v99_v21, %v99_v21  ;;  %v625_v30 = vld [vmem:[#allocation12 + $0x30] sm:$0xff]  }
  0x71   : > { %527 = vmatpush3.bf16.msra.mxu0 %v607_v8  ;;  %v312_v34 = vld [vmem:[%s1015_s6] sm:$0x1] }
  0x72   : > { %547 = vmatpush3.bf16.msra.mxu1 %v608_v9  ;;  %528 = vmatprep.subr.bf16.mxu0 %v800_v4  ;;  %v335_v45 = vld [vmem:[%s1017_s8] sm:$0x1] }
  0x73   : > { %548 = vmatprep.subr.bf16.mxu1 %v800_v4 }
  0x75   : > { %529 = vmatpush3.bf16.msra.mxu0 %v609_v10 }
  0x76   : > { %549 = vmatpush3.bf16.msra.mxu1 %v610_v11  ;;  %530 = vmatprep.subr.bf16.mxu0 %v800_v4 }
  0x77   : > { %550 = vmatprep.subr.bf16.mxu1 %v800_v4 }
  0x79   : > { %531 = vmatpush3.bf16.msra.mxu0 %v611_v12 }
  0x7a   : > { %551 = vmatpush3.bf16.msra.mxu1 %v612_v13  ;;  %532 = vmatprep.subr.bf16.mxu0 %v800_v4 }
  0x7b   : > { %552 = vmatprep.subr.bf16.mxu1 %v800_v4 }
  0x7d   : > { %533 = vmatpush3.bf16.msra.mxu0 %v613_v14 }
  0x7e   : > { %553 = vmatpush3.bf16.msra.mxu1 %v614_v15  ;;  %534 = vmatprep.subr.bf16.mxu0 %v800_v4 }
  0x7f   : > { %554 = vmatprep.subr.bf16.mxu1 %v800_v4 }
  0x81   : > { %535 = vmatpush3.bf16.msra.mxu0 %v615_v16 }
  0x82   : > { %555 = vmatpush3.bf16.msra.mxu1 %v616_v17  ;;  %536 = vmatprep.subr.bf16.mxu0 %v800_v4 }
  0x83   : > { %556 = vmatprep.subr.bf16.mxu1 %v800_v4 }
  0x85   : > { %537 = vmatpush3.bf16.msra.mxu0 %v617_v18 }
  0x86   : > { %557 = vmatpush3.bf16.msra.mxu1 %v618_v20  ;;  %562 = vmatprep.subr.bf16.mxu0 %v800_v4 }
  0x88   : > { %539 = vmatmul.mubr.bf16.vlgmr.msra.gmra.mrb[0].mxu0 %v103_v22 }
  0x89   : > { %559 = vmatmul.mubr.bf16.vlgmr.msra.gmra.mrb[0].mxu1 %v100_v23  ;;  %563 = vmatpush3.bf16.msra.mxu0 %v619_v24 }
  0x8a   : > { %564 = vmatprep.subr.bf16.mxu0 %v800_v4  ;;  %578 = vmatprep.mubr.msk.bf16.mxu0 %vm801_vm0, %v800_v4 }
  0x8d   : > { %565 = vmatpush3.bf16.msra.mxu0 %v620_v25 }
  0x8e   : > { %566 = vmatprep.subr.bf16.mxu0 %v800_v4 }
  0x91   : > { %567 = vmatpush3.bf16.msra.mxu0 %v621_v26 }
  0x92   : > { %568 = vmatprep.subr.bf16.mxu0 %v800_v4 }
  0x95   : > { %569 = vmatpush3.bf16.msra.mxu0 %v622_v27 }
  0x96   : > { %570 = vmatprep.subr.bf16.mxu0 %v800_v4 }
  0x99   : > { %571 = vmatpush3.bf16.msra.mxu0 %v623_v28 }
  0x9a   : > { %572 = vmatprep.subr.bf16.mxu0 %v800_v4 }
  0x9d   : > { %573 = vmatpush3.bf16.msra.mxu0 %v624_v29 }
  0x9e   : > { %574 = vmatprep.subr.bf16.mxu0 %v800_v4 }
  0xa1   : > { %575 = vmatpush3.bf16.msra.mxu0 %v625_v30 }
  0xa2   : > { %576 = vmatprep.subr.bf16.mxu0 %v800_v4 }
  0xa5   : > { %577 = vmatpush3.bf16.msra.mxu0 %v626_v31 }
 0x15b   : > { %v218_v32 = vpop.f32.mrb[0].mxu0 }
 0x15c   : > { %v306_v33 = vpop.f32.mrb[0].mxu1  ;;  %v540_v35 = vpop.f32.mrb[1].mxu0 }
 0x15d   : > { %v307_v36 = vadd.f32 %v306_v33, %v218_v32  ;;  %v560_v37 = vpop.f32.mrb[1].mxu1  ;;  %v221_v38 = vpop.f32.mrb[2].mxu0 }
 0x15e   : > { %v309_v39 = vpop.f32.mrb[2].mxu1  ;;  %v541_v40 = vpop.f32.mrb[3].mxu0 }
 0x15f   : > { %v313_v41 = vadd.f32 %v312_v34, %v307_v36  ;;  %v561_v42 = vpop.f32.mrb[3].mxu1 }
 0x161   : > { %627 = vtanh.f32 %v313_v41 }
 0x16b   : > { %v628_v43 = vpop.eup %627 }
 0x16c   : > { %317 = vst [vmem:[%s316_s2] sm:$0x1] %v628_v43  ;;  %v318_v44 = vpack.c.bf16 %v628_v43, %v628_v43 }
 0x16e   : > { %579 = vmatmul.mubr.bf16.vlgmr.msra.gmra.mrb[4].mxu0 %v318_v44 }
 0x23e   :  { %95 = sbr.rel (!%p92_p10) target bundleno = 103 (0x67), region = 75 }
 0x241   : > { %v418_v46 = vpop.f32.mrb[4].mxu0 }
 0x242   : > { %v419_v47 = vadd.f32 %v418_v46, %v335_v45  ;;  %v580_v48 = vpop.f32.mrb[5].mxu0 }
 0x243   : > { %v421_v49 = vpop.f32.mrb[6].mxu0 }
 0x244   : > { %425 = vst [vmem:[%s424_s12] sm:$0x1] %v419_v47  ;;  %v581_v50 = vpop.f32.mrb[7].mxu0 }
 0x245 PF:  { %v426_v51 = vld [vmem:[#allocation2] sm:$0xff]  ;;  %s802_s14 = smov [#allocation13]   ;;  %s803_s16 = smov [#allocation14]  }
 0x246   :  { %v427_v52 = vpack.c.bf16 %v426_v51, %v426_v51  ;;  %s435_s15 = sshll.u32 %s802_s14, 4  ;;  %s445_s17 = sshll.u32 %s803_s16, 4  ;;  %s436_s15 = int_to_ptr.vmem [resolvable:$true] %s435_s15  ;;  %s446_s17 = int_to_ptr.vmem [resolvable:$true] %s445_s17 }
 0x247   :  { %s729_s18 = scalar_lea.vmem %s446_s17, 128  ;;  %p734_p12 = scmp.lt.s32.totalorder %s446_s17, %s446_s17 }
 0x248   :  { %428 = vst [vmem:[#allocation13] sm:$0xf] %v427_v52  ;;  %p730_p11 = scmp.ne.s32.totalorder %s446_s17, %s729_s18  ;;  %p735_p13 = scmp.lt.s32.totalorder %s729_s18, %s729_s18 }
 0x24a   :  { %p736_p0 = por %p735_p13, %p734_p12 }
 0x24c   :  { %p737_p1 = pnand %p736_p0, %p730_p11 }
 0x24e   :  { %740 = shalt.err (!%p737_p1)
}
 0x24f   :  { %s741_s6 = scalar_lea.hbm %s1019_s10, 128 }
 0x250   :  { %p742_p2 = scmp.ne.s32.totalorder %s1019_s10, %s741_s6  ;;  %p745_p3 = scmp.lt.u32.totalorder %s741_s6, %s1019_s10 }
 0x252   :  { %p747_p4 = pnand %p745_p3, %p742_p2 }
 0x254   :  { %750 = shalt.err (!%p747_p4)
}
 0x255   :  { %448 = dma.vmem_to_hbm [thread:$0]  %s446_s17, 128, %s1019_s10, [#allocation15]  }
 0x256   :  { %s751_s26 = scalar_lea.vmem %s436_s15, 64  ;;  %p756_p6 = scmp.lt.s32.totalorder %s436_s15, %s436_s15 }
 0x257   :  { %p752_p5 = scmp.ne.s32.totalorder %s436_s15, %s751_s26  ;;  %p757_p7 = scmp.lt.s32.totalorder %s751_s26, %s751_s26 }
 0x259   :  { %p758_p8 = por %p757_p7, %p756_p6 }
 0x25b   :  { %p759_p9 = pnand %p758_p8, %p752_p5 }
 0x25d   :  { %762 = shalt.err (!%p759_p9)
}
 0x25e   :  { %s763_s7 = scalar_lea.hbm %s1018_s9, 64 }
 0x25f   :  { %p764_p10 = scmp.ne.s32.totalorder %s1018_s9, %s763_s7  ;;  %p767_p11 = scmp.lt.u32.totalorder %s763_s7, %s1018_s9 }
 0x261   :  { %p769_p12 = pnand %p767_p11, %p764_p10 }
 0x263   :  { %772 = shalt.err (!%p769_p12)
}
 0x264   :  { %438 = dma.vmem_to_hbm [thread:$0]  %s436_s15, 64, %s1018_s9, [#allocation9]  }
 0x265   :  { %783 = dma.done.wait [#allocation9], 64  }
 0x266   :  { %784 = vsyncadd [#allocation9], 4294967232 }
 0x267   :  { %785 = dma.done.wait [#allocation15], 128  }
 0x268   :  { %786 = vsyncadd [#allocation15], 4294967168 }
 0x269   :  { %455 = vsyncpa [#allocation8], 1 }
 0x26a   :  { %456 = vsyncpa [#allocation11], 1 }
 0x26b   :  { %457 = vsyncpa [#allocation9], 1 }
 0x26c   :  { %458 = vsyncpa [#allocation15], 1 }

</bundles_post_ra>
